<compile_context>
chip_gen: v6e
topology: v6e:2x2x1
jax: 0.10.0
libtpu: 0.0.40
codegen_flags: <defaults>
</compile_context>

<pallas_src>
import jax
import jax.numpy as jnp
from jax.experimental import pallas as pl
from jax.experimental.pallas import tpu as pltpu


def gated_gcn_kernel(x_ref, ex_ref, ssrc_ref, sdst_ref, snn_ref, sne_ref,
                     wf_ref, bf_ref, wc_ref, rows_ref,
                     h_out_ref, e_out_ref):
    f32 = jnp.float32
    D = x_ref.shape[1]

    X = x_ref[...]          # [N, D]
    EXin = ex_ref[...]      # [M, D]

    # Row-parameter slab: [bc; gamma_h; beta_h; gamma_e; beta_e], each [1, D].
    bc = rows_ref[0:1, :]
    gamma_h = rows_ref[1:2, :]
    beta_h = rows_ref[2:3, :]
    gamma_e = rows_ref[3:4, :]
    beta_e = rows_ref[4:5, :]

    # ---- Fused node projections: one lane-dense [N, 4D] MXU matmul. ----------
    # Column blocks of wf are ordered [Wd | Wb | We | Wa] so the pair consumed by
    # the source gather is a contiguous offset-0 slice.
    P = jnp.dot(X, wf_ref[...], preferred_element_type=f32) + bf_ref[...]   # [N, 4D]
    DXBX = P[:, :2 * D]           # [N, 2D] = [D(X) | B(X)]
    EXl = P[:, 2 * D:3 * D]       # [N, D]  = E(X)
    AX = P[:, 3 * D:]             # [N, D]  = A(X)

    CE = jnp.dot(EXin, wc_ref[...], preferred_element_type=f32) + bc        # [M, D]

    # Connectivity one-hots arrive as bf16 (0/1 exact); upcast once for f32 math.
    Ssrc = ssrc_ref[...].astype(f32)      # [M, N]
    Sdst = sdst_ref[...].astype(f32)      # [M, N]

    # ---- message_func: e_j = C(E_X) + D(X)[src] + E(X)[dst] -------------------
    # Paired gather: one [M, 2D] matmul yields both D(X)[src] and B(X)[src].
    G = jnp.dot(Ssrc, DXBX, preferred_element_type=f32)       # [M, 2D]
    DX_src = G[:, :D]
    BX_src = G[:, D:]
    EX_dst = jnp.dot(Sdst, EXl, preferred_element_type=f32)   # [M, D]

    e = CE + DX_src + EX_dst                                   # [M, D] (= edata['E'])
    sig = jax.nn.sigmoid(e)

    # ---- reduce_func: H = A(X) + nan_to_num( sum sig*Bx / sum sig ) -----------
    # Single contraction over the edge axis of Sdst gives numerator and
    # denominator together; no separate SdstT input.
    scat_in = jnp.concatenate([sig * BX_src, sig], axis=1)     # [M, 2D]
    R = jax.lax.dot_general(Sdst, scat_in,
                            dimension_numbers=(((0,), (0,)), ((), ())),
                            preferred_element_type=f32)        # [N, 2D]
    num = R[:, :D]
    den = R[:, D:]
    # torch.nan_to_num: only 0/0 -> NaN is reachable (sigmoid > 0 makes den > 0
    # whenever a node has any in-edge); +/-inf cannot occur here.
    frac = num / den
    frac = jnp.where(jnp.isnan(frac), jnp.zeros_like(frac), frac)
    H = AX + frac                                              # [N, D]

    # ---- snorm scaling --------------------------------------------------------
    H = H * snn_ref[...]
    E = e * sne_ref[...]

    # ---- BatchNorm1d (training mode: batch mean, biased variance), eps=1e-5 ---
    eps = 1e-5
    mH = jnp.mean(H, axis=0, keepdims=True)
    vH = jnp.mean((H - mH) ** 2, axis=0, keepdims=True)
    H = (H - mH) * jax.lax.rsqrt(vH + eps) * gamma_h + beta_h

    mE = jnp.mean(E, axis=0, keepdims=True)
    vE = jnp.mean((E - mE) ** 2, axis=0, keepdims=True)
    E = (E - mE) * jax.lax.rsqrt(vE + eps) * gamma_e + beta_e

    # ---- ReLU + residual ------------------------------------------------------
    h_out_ref[...] = X + jnp.maximum(H, 0.0)
    e_out_ref[...] = EXin + jnp.maximum(E, 0.0)


def gated_gcn_forward(X, E_X, src, dst, snorm_n, snorm_e, params):
    N, D = X.shape
    M = E_X.shape[0]

    # Dense one-hot connectivity in bf16 (0/1 exact); SdstT is not materialized.
    Ssrc = jax.nn.one_hot(src, N, dtype=jnp.bfloat16)   # [M, N]
    Sdst = jax.nn.one_hot(dst, N, dtype=jnp.bfloat16)   # [M, N]

    # Fuse the four X projections into one [D, 4D] weight: [Wd | Wb | We | Wa].
    W_fused = jnp.concatenate(
        [params['Wd'], params['Wb'], params['We'], params['Wa']], axis=1)
    b_fused = jnp.concatenate(
        [params['bd'], params['bb'], params['be'], params['ba']], axis=1)

    # All D-wide row parameters in one [5, D] slab (single VMEM tile / DMA).
    row_params = jnp.concatenate(
        [params['bc'], params['gamma_h'], params['beta_h'],
         params['gamma_e'], params['beta_e']], axis=0)

    inputs = (X, E_X, Ssrc, Sdst, snorm_n, snorm_e,
              W_fused, b_fused, params['Wc'], row_params)

    def full_spec(a):
        nd = a.ndim
        return pl.BlockSpec(a.shape, lambda i, nd=nd: (0,) * nd)

    in_specs = [full_spec(a) for a in inputs]
    out_specs = (pl.BlockSpec((N, D), lambda i: (0, 0)),
                 pl.BlockSpec((M, D), lambda i: (0, 0)))
    out_shape = (jax.ShapeDtypeStruct((N, D), X.dtype),
                 jax.ShapeDtypeStruct((M, D), X.dtype))

    return pl.pallas_call(
        gated_gcn_kernel,
        grid=(1,),
        in_specs=in_specs,
        out_specs=out_specs,
        out_shape=out_shape,
        compiler_params=pltpu.CompilerParams(
            dimension_semantics=("arbitrary",),
            vmem_limit_bytes=32 * 1024 * 1024),
    )(*inputs)


def reference_forward(X, E_X, src, dst, snorm_n, snorm_e, params):
    """Pure-JAX f32 reference of the same math, for a correctness check."""
    Ssrc = jax.nn.one_hot(src, X.shape[0], dtype=X.dtype)
    Sdst = jax.nn.one_hot(dst, X.shape[0], dtype=X.dtype)
    AX = X @ params['Wa'] + params['ba']
    BX = X @ params['Wb'] + params['bb']
    DX = X @ params['Wd'] + params['bd']
    EXl = X @ params['We'] + params['be']
    CE = E_X @ params['Wc'] + params['bc']
    e = CE + Ssrc @ DX + Sdst @ EXl
    sig = jax.nn.sigmoid(e)
    frac = (Sdst.T @ (sig * (Ssrc @ BX))) / (Sdst.T @ sig)
    frac = jnp.nan_to_num(frac, nan=0.0)
    H = (AX + frac) * snorm_n
    E = e * snorm_e
    eps = 1e-5

    def bn(v, g, b):
        m = jnp.mean(v, axis=0, keepdims=True)
        var = jnp.mean((v - m) ** 2, axis=0, keepdims=True)
        return (v - m) * jax.lax.rsqrt(var + eps) * g + b

    H = jnp.maximum(bn(H, params['gamma_h'], params['beta_h']), 0.0)
    E = jnp.maximum(bn(E, params['gamma_e'], params['beta_e']), 0.0)
    return X + H, E_X + E


if __name__ == "__main__":
    N, M, D = 8, 16, 32  # 8 nodes, 16 edges, input_dim = output_dim = 32
    key = jax.random.PRNGKey(0)
    keys = jax.random.split(key, 16)

    X = jax.random.normal(keys[0], (N, D), jnp.float32)
    E_X = jax.random.normal(keys[1], (M, D), jnp.float32)
    # graph: self-loops + a ring, so every node has >= 1 in-edge
    src = jnp.concatenate([jnp.arange(N), jnp.arange(N)]).astype(jnp.int32)
    dst = jnp.concatenate([jnp.arange(N), (jnp.arange(N) + 1) % N]).astype(jnp.int32)
    snorm_n = jax.random.uniform(keys[2], (N, 1), jnp.float32, 0.5, 1.5)
    snorm_e = jax.random.uniform(keys[3], (M, 1), jnp.float32, 0.5, 1.5)

    def lin_init(kw, kb):
        W = 0.1 * jax.random.normal(kw, (D, D), jnp.float32)
        b = 0.1 * jax.random.normal(kb, (1, D), jnp.float32)
        return W, b

    Wa, ba = lin_init(keys[4], keys[5])
    Wb, bb = lin_init(keys[6], keys[7])
    Wc, bc = lin_init(keys[8], keys[9])
    Wd, bd = lin_init(keys[10], keys[11])
    We, be = lin_init(keys[12], keys[13])

    params = dict(Wa=Wa, ba=ba, Wb=Wb, bb=bb, Wc=Wc, bc=bc, Wd=Wd, bd=bd,
                  We=We, be=be,
                  gamma_h=jnp.ones((1, D), jnp.float32),
                  beta_h=jnp.zeros((1, D), jnp.float32),
                  gamma_e=jnp.ones((1, D), jnp.float32),
                  beta_e=jnp.zeros((1, D), jnp.float32))

    H_out, E_out = gated_gcn_forward(X, E_X, src, dst, snorm_n, snorm_e, params)
    H_out = jax.block_until_ready(H_out)
    E_out = jax.block_until_ready(E_out)

    H_ref, E_ref = reference_forward(X, E_X, src, dst, snorm_n, snorm_e, params)
    assert jnp.allclose(H_out, H_ref, atol=1e-4, rtol=1e-4)
    assert jnp.allclose(E_out, E_ref, atol=1e-4, rtol=1e-4)

    print("KERNEL_OK")
</pallas_src>

<mosaic_0001>
module attributes {stable_mosaic.version = 11 : i64} {
  func.func @gated_gcn_kernel(%arg0: i32, %arg1: memref<8x32xf32, #tpu.memory_space<vmem>>, %arg2: memref<16x32xf32, #tpu.memory_space<vmem>>, %arg3: memref<16x8xbf16, #tpu.memory_space<vmem>>, %arg4: memref<16x8xbf16, #tpu.memory_space<vmem>>, %arg5: memref<8x1xf32, #tpu.memory_space<vmem>>, %arg6: memref<16x1xf32, #tpu.memory_space<vmem>>, %arg7: memref<32x128xf32, #tpu.memory_space<vmem>>, %arg8: memref<1x128xf32, #tpu.memory_space<vmem>>, %arg9: memref<32x32xf32, #tpu.memory_space<vmem>>, %arg10: memref<5x32xf32, #tpu.memory_space<vmem>>, %arg11: memref<8x32xf32, #tpu.memory_space<vmem>>, %arg12: memref<16x32xf32, #tpu.memory_space<vmem>>) attributes {dimension_semantics = [#tpu.dimension_semantics<arbitrary>], iteration_bounds = array<i64: 1>, scalar_prefetch = 0 : i64, scratch_operands = 0 : i64, tpu.core_type = #tpu.core_type<tc>, window_params = [{pipeline_mode = #tpu.pipeline_mode<synchronous>, transform_indices = @transform_0, window_bounds = array<i64: 8, 32>}, {pipeline_mode = #tpu.pipeline_mode<synchronous>, transform_indices = @transform_1, window_bounds = array<i64: 16, 32>}, {pipeline_mode = #tpu.pipeline_mode<synchronous>, transform_indices = @transform_2, window_bounds = array<i64: 16, 8>}, {pipeline_mode = #tpu.pipeline_mode<synchronous>, transform_indices = @transform_3, window_bounds = array<i64: 16, 8>}, {pipeline_mode = #tpu.pipeline_mode<synchronous>, transform_indices = @transform_4, window_bounds = array<i64: 8, 1>}, {pipeline_mode = #tpu.pipeline_mode<synchronous>, transform_indices = @transform_5, window_bounds = array<i64: 16, 1>}, {pipeline_mode = #tpu.pipeline_mode<synchronous>, transform_indices = @transform_6, window_bounds = array<i64: 32, 128>}, {pipeline_mode = #tpu.pipeline_mode<synchronous>, transform_indices = @transform_7, window_bounds = array<i64: 1, 128>}, {pipeline_mode = #tpu.pipeline_mode<synchronous>, transform_indices = @transform_8, window_bounds = array<i64: 32, 32>}, {pipeline_mode = #tpu.pipeline_mode<synchronous>, transform_indices = @transform_9, window_bounds = array<i64: 5, 32>}, {pipeline_mode = #tpu.pipeline_mode<synchronous>, transform_indices = @transform_10, window_bounds = array<i64: 8, 32>}, {pipeline_mode = #tpu.pipeline_mode<synchronous>, transform_indices = @transform_11, window_bounds = array<i64: 16, 32>}]} {
    %c0 = arith.constant 0 : index
    %c0_0 = arith.constant 0 : index
    %0 = vector.load %arg1[%c0, %c0_0] : memref<8x32xf32, #tpu.memory_space<vmem>>, vector<8x32xf32>
    %c0_1 = arith.constant 0 : index
    %c0_2 = arith.constant 0 : index
    %1 = vector.load %arg2[%c0_1, %c0_2] : memref<16x32xf32, #tpu.memory_space<vmem>>, vector<16x32xf32>
    %c0_3 = arith.constant 0 : index
    %c0_4 = arith.constant 0 : index
    %2 = vector.load %arg10[%c0_3, %c0_4] : memref<5x32xf32, #tpu.memory_space<vmem>>, vector<1x32xf32>
    %c1 = arith.constant 1 : index
    %c0_5 = arith.constant 0 : index
    %3 = vector.load %arg10[%c1, %c0_5] : memref<5x32xf32, #tpu.memory_space<vmem>>, vector<1x32xf32>
    %c2 = arith.constant 2 : index
    %c0_6 = arith.constant 0 : index
    %4 = vector.load %arg10[%c2, %c0_6] : memref<5x32xf32, #tpu.memory_space<vmem>>, vector<1x32xf32>
    %c3 = arith.constant 3 : index
    %c0_7 = arith.constant 0 : index
    %5 = vector.load %arg10[%c3, %c0_7] : memref<5x32xf32, #tpu.memory_space<vmem>>, vector<1x32xf32>
    %c4 = arith.constant 4 : index
    %c0_8 = arith.constant 0 : index
    %6 = vector.load %arg10[%c4, %c0_8] : memref<5x32xf32, #tpu.memory_space<vmem>>, vector<1x32xf32>
    %c0_9 = arith.constant 0 : index
    %c0_10 = arith.constant 0 : index
    %7 = vector.load %arg7[%c0_9, %c0_10] : memref<32x128xf32, #tpu.memory_space<vmem>>, vector<32x128xf32>
    %cst = arith.constant dense<0.000000e+00> : vector<8x128xf32>
    %8 = tpu.matmul %0, %7, %cst {dimension_numbers = #tpu.dot_dimension_numbers<[1], [0], [0], [1], [0, 0, 1, 1], [], []>} : vector<8x32xf32>, vector<32x128xf32>, vector<8x128xf32> -> vector<8x128xf32>
    %c0_11 = arith.constant 0 : index
    %c0_12 = arith.constant 0 : index
    %9 = vector.load %arg8[%c0_11, %c0_12] : memref<1x128xf32, #tpu.memory_space<vmem>>, vector<1x128xf32>
    %10 = vector.broadcast %9 : vector<1x128xf32> to vector<8x128xf32>
    %11 = arith.addf %8, %10 : vector<8x128xf32>
    %12 = vector.extract_strided_slice %11 {offsets = [0, 0], sizes = [8, 64], strides = [1, 1]} : vector<8x128xf32> to vector<8x64xf32>
    %13 = vector.extract_strided_slice %11 {offsets = [0, 64], sizes = [8, 32], strides = [1, 1]} : vector<8x128xf32> to vector<8x32xf32>
    %14 = vector.extract_strided_slice %11 {offsets = [0, 96], sizes = [8, 32], strides = [1, 1]} : vector<8x128xf32> to vector<8x32xf32>
    %c0_13 = arith.constant 0 : index
    %c0_14 = arith.constant 0 : index
    %15 = vector.load %arg9[%c0_13, %c0_14] : memref<32x32xf32, #tpu.memory_space<vmem>>, vector<32x32xf32>
    %cst_15 = arith.constant dense<0.000000e+00> : vector<16x32xf32>
    %16 = tpu.matmul %1, %15, %cst_15 {dimension_numbers = #tpu.dot_dimension_numbers<[1], [0], [0], [1], [0, 0, 1, 1], [], []>} : vector<16x32xf32>, vector<32x32xf32>, vector<16x32xf32> -> vector<16x32xf32>
    %17 = vector.broadcast %2 : vector<1x32xf32> to vector<16x32xf32>
    %18 = arith.addf %16, %17 : vector<16x32xf32>
    %c0_16 = arith.constant 0 : index
    %c0_17 = arith.constant 0 : index
    %19 = vector.load %arg3[%c0_16, %c0_17] : memref<16x8xbf16, #tpu.memory_space<vmem>>, vector<16x8xbf16>
    %20 = arith.extf %19 : vector<16x8xbf16> to vector<16x8xf32>
    %c0_18 = arith.constant 0 : index
    %c0_19 = arith.constant 0 : index
    %21 = vector.load %arg4[%c0_18, %c0_19] : memref<16x8xbf16, #tpu.memory_space<vmem>>, vector<16x8xbf16>
    %22 = arith.extf %21 : vector<16x8xbf16> to vector<16x8xf32>
    %cst_20 = arith.constant dense<0.000000e+00> : vector<16x64xf32>
    %23 = tpu.matmul %20, %12, %cst_20 {dimension_numbers = #tpu.dot_dimension_numbers<[1], [0], [0], [1], [0, 0, 1, 1], [], []>} : vector<16x8xf32>, vector<8x64xf32>, vector<16x64xf32> -> vector<16x64xf32>
    %24 = vector.extract_strided_slice %23 {offsets = [0, 0], sizes = [16, 32], strides = [1, 1]} : vector<16x64xf32> to vector<16x32xf32>
    %25 = vector.extract_strided_slice %23 {offsets = [0, 32], sizes = [16, 32], strides = [1, 1]} : vector<16x64xf32> to vector<16x32xf32>
    %cst_21 = arith.constant dense<0.000000e+00> : vector<16x32xf32>
    %26 = tpu.matmul %22, %13, %cst_21 {dimension_numbers = #tpu.dot_dimension_numbers<[1], [0], [0], [1], [0, 0, 1, 1], [], []>} : vector<16x8xf32>, vector<8x32xf32>, vector<16x32xf32> -> vector<16x32xf32>
    %27 = arith.addf %18, %24 : vector<16x32xf32>
    %28 = arith.addf %27, %26 : vector<16x32xf32>
    %29 = arith.negf %28 : vector<16x32xf32>
    %30 = math.exp %29 : vector<16x32xf32>
    %cst_22 = arith.constant 1.000000e+00 : f32
    %31 = vector.broadcast %cst_22 : f32 to vector<16x32xf32>
    %32 = arith.addf %31, %30 : vector<16x32xf32>
    %33 = arith.divf %31, %32 : vector<16x32xf32>
    %34 = arith.mulf %33, %25 : vector<16x32xf32>
    %35 = tpu.concatenate %34, %33 in 1 : vector<16x32xf32>, vector<16x32xf32> -> vector<16x64xf32>
    %cst_23 = arith.constant dense<0.000000e+00> : vector<8x64xf32>
    %36 = tpu.matmul %22, %35, %cst_23 {dimension_numbers = #tpu.dot_dimension_numbers<[0], [0], [1], [1], [0, 1, 1, 1], [], []>} : vector<16x8xf32>, vector<16x64xf32>, vector<8x64xf32> -> vector<8x64xf32>
    %37 = vector.extract_strided_slice %36 {offsets = [0, 0], sizes = [8, 32], strides = [1, 1]} : vector<8x64xf32> to vector<8x32xf32>
    %38 = vector.extract_strided_slice %36 {offsets = [0, 32], sizes = [8, 32], strides = [1, 1]} : vector<8x64xf32> to vector<8x32xf32>
    %39 = arith.divf %37, %38 : vector<8x32xf32>
    %40 = arith.cmpf one, %39, %39 : vector<8x32xf32>
    %cst_24 = arith.constant 0.000000e+00 : f32
    %41 = vector.broadcast %cst_24 : f32 to vector<8x32xf32>
    %42 = arith.select %40, %41, %39 : vector<8x32xi1>, vector<8x32xf32>
    %43 = arith.addf %14, %42 : vector<8x32xf32>
    %c0_25 = arith.constant 0 : index
    %c0_26 = arith.constant 0 : index
    %44 = vector.load %arg5[%c0_25, %c0_26] : memref<8x1xf32, #tpu.memory_space<vmem>>, vector<8x1xf32>
    %45 = vector.broadcast %44 : vector<8x1xf32> to vector<8x32xf32>
    %46 = arith.mulf %43, %45 : vector<8x32xf32>
    %c0_27 = arith.constant 0 : index
    %c0_28 = arith.constant 0 : index
    %47 = vector.load %arg6[%c0_27, %c0_28] : memref<16x1xf32, #tpu.memory_space<vmem>>, vector<16x1xf32>
    %48 = vector.broadcast %47 : vector<16x1xf32> to vector<16x32xf32>
    %49 = arith.mulf %28, %48 : vector<16x32xf32>
    %cst_29 = arith.constant dense<0.000000e+00> : vector<32xf32>
    %50 = vector.multi_reduction <add>, %46, %cst_29 [0] : vector<8x32xf32> to vector<32xf32>
    %51 = vector.shape_cast %50 : vector<32xf32> to vector<1x32xf32>
    %cst_30 = arith.constant 8.000000e+00 : f32
    %52 = vector.broadcast %cst_30 : f32 to vector<1x32xf32>
    %53 = arith.divf %51, %52 : vector<1x32xf32>
    %54 = vector.broadcast %53 : vector<1x32xf32> to vector<8x32xf32>
    %55 = arith.subf %46, %54 : vector<8x32xf32>
    %56 = arith.mulf %55, %55 : vector<8x32xf32>
    %cst_31 = arith.constant dense<0.000000e+00> : vector<32xf32>
    %57 = vector.multi_reduction <add>, %56, %cst_31 [0] : vector<8x32xf32> to vector<32xf32>
    %58 = vector.shape_cast %57 : vector<32xf32> to vector<1x32xf32>
    %cst_32 = arith.constant 8.000000e+00 : f32
    %59 = vector.broadcast %cst_32 : f32 to vector<1x32xf32>
    %60 = arith.divf %58, %59 : vector<1x32xf32>
    %61 = vector.broadcast %53 : vector<1x32xf32> to vector<8x32xf32>
    %62 = arith.subf %46, %61 : vector<8x32xf32>
    %cst_33 = arith.constant 9.99999974E-6 : f32
    %63 = vector.broadcast %cst_33 : f32 to vector<1x32xf32>
    %64 = arith.addf %60, %63 : vector<1x32xf32>
    %65 = math.rsqrt %64 : vector<1x32xf32>
    %66 = vector.broadcast %65 : vector<1x32xf32> to vector<8x32xf32>
    %67 = arith.mulf %62, %66 : vector<8x32xf32>
    %68 = vector.broadcast %3 : vector<1x32xf32> to vector<8x32xf32>
    %69 = arith.mulf %67, %68 : vector<8x32xf32>
    %70 = vector.broadcast %4 : vector<1x32xf32> to vector<8x32xf32>
    %71 = arith.addf %69, %70 : vector<8x32xf32>
    %cst_34 = arith.constant dense<0.000000e+00> : vector<32xf32>
    %72 = vector.multi_reduction <add>, %49, %cst_34 [0] : vector<16x32xf32> to vector<32xf32>
    %73 = vector.shape_cast %72 : vector<32xf32> to vector<1x32xf32>
    %cst_35 = arith.constant 1.600000e+01 : f32
    %74 = vector.broadcast %cst_35 : f32 to vector<1x32xf32>
    %75 = arith.divf %73, %74 : vector<1x32xf32>
    %76 = vector.broadcast %75 : vector<1x32xf32> to vector<16x32xf32>
    %77 = arith.subf %49, %76 : vector<16x32xf32>
    %78 = arith.mulf %77, %77 : vector<16x32xf32>
    %cst_36 = arith.constant dense<0.000000e+00> : vector<32xf32>
    %79 = vector.multi_reduction <add>, %78, %cst_36 [0] : vector<16x32xf32> to vector<32xf32>
    %80 = vector.shape_cast %79 : vector<32xf32> to vector<1x32xf32>
    %cst_37 = arith.constant 1.600000e+01 : f32
    %81 = vector.broadcast %cst_37 : f32 to vector<1x32xf32>
    %82 = arith.divf %80, %81 : vector<1x32xf32>
    %83 = vector.broadcast %75 : vector<1x32xf32> to vector<16x32xf32>
    %84 = arith.subf %49, %83 : vector<16x32xf32>
    %cst_38 = arith.constant 9.99999974E-6 : f32
    %85 = vector.broadcast %cst_38 : f32 to vector<1x32xf32>
    %86 = arith.addf %82, %85 : vector<1x32xf32>
    %87 = math.rsqrt %86 : vector<1x32xf32>
    %88 = vector.broadcast %87 : vector<1x32xf32> to vector<16x32xf32>
    %89 = arith.mulf %84, %88 : vector<16x32xf32>
    %90 = vector.broadcast %5 : vector<1x32xf32> to vector<16x32xf32>
    %91 = arith.mulf %89, %90 : vector<16x32xf32>
    %92 = vector.broadcast %6 : vector<1x32xf32> to vector<16x32xf32>
    %93 = arith.addf %91, %92 : vector<16x32xf32>
    %cst_39 = arith.constant 0.000000e+00 : f32
    %94 = vector.broadcast %cst_39 : f32 to vector<8x32xf32>
    %95 = arith.maximumf %71, %94 : vector<8x32xf32>
    %96 = arith.addf %0, %95 : vector<8x32xf32>
    %c0_40 = arith.constant 0 : index
    %c0_41 = arith.constant 0 : index
    %97 = vector.load %arg11[%c0_40, %c0_41] : memref<8x32xf32, #tpu.memory_space<vmem>>, vector<8x32xf32>
    tpu.vector_store %arg11[%c0_40, %c0_41], %96 {strides = array<i32>} : memref<8x32xf32, #tpu.memory_space<vmem>>, vector<8x32xf32>,
    %cst_42 = arith.constant 0.000000e+00 : f32
    %98 = vector.broadcast %cst_42 : f32 to vector<16x32xf32>
    %99 = arith.maximumf %93, %98 : vector<16x32xf32>
    %100 = arith.addf %1, %99 : vector<16x32xf32>
    %c0_43 = arith.constant 0 : index
    %c0_44 = arith.constant 0 : index
    %101 = vector.load %arg12[%c0_43, %c0_44] : memref<16x32xf32, #tpu.memory_space<vmem>>, vector<16x32xf32>
    tpu.vector_store %arg12[%c0_43, %c0_44], %100 {strides = array<i32>} : memref<16x32xf32, #tpu.memory_space<vmem>>, vector<16x32xf32>,
    return
  }
  func.func @transform_0(%arg0: i32) -> (i32, i32) {
    %c0_i32 = arith.constant 0 : i32
    %c0_i32_0 = arith.constant 0 : i32
    %c0_i32_1 = arith.constant 0 : i32
    return %c0_i32, %c0_i32_0 : i32, i32
  }
  func.func @transform_1(%arg0: i32) -> (i32, i32) {
    %c0_i32 = arith.constant 0 : i32
    %c0_i32_0 = arith.constant 0 : i32
    %c0_i32_1 = arith.constant 0 : i32
    return %c0_i32, %c0_i32_0 : i32, i32
  }
  func.func @transform_2(%arg0: i32) -> (i32, i32) {
    %c0_i32 = arith.constant 0 : i32
    %c0_i32_0 = arith.constant 0 : i32
    %c0_i32_1 = arith.constant 0 : i32
    return %c0_i32, %c0_i32_0 : i32, i32
  }
  func.func @transform_3(%arg0: i32) -> (i32, i32) {
    %c0_i32 = arith.constant 0 : i32
    %c0_i32_0 = arith.constant 0 : i32
    %c0_i32_1 = arith.constant 0 : i32
    return %c0_i32, %c0_i32_0 : i32, i32
  }
  func.func @transform_4(%arg0: i32) -> (i32, i32) {
    %c0_i32 = arith.constant 0 : i32
    %c0_i32_0 = arith.constant 0 : i32
    %c0_i32_1 = arith.constant 0 : i32
    return %c0_i32, %c0_i32_0 : i32, i32
  }
  func.func @transform_5(%arg0: i32) -> (i32, i32) {
    %c0_i32 = arith.constant 0 : i32
    %c0_i32_0 = arith.constant 0 : i32
    %c0_i32_1 = arith.constant 0 : i32
    return %c0_i32, %c0_i32_0 : i32, i32
  }
  func.func @transform_6(%arg0: i32) -> (i32, i32) {
    %c0_i32 = arith.constant 0 : i32
    %c0_i32_0 = arith.constant 0 : i32
    %c0_i32_1 = arith.constant 0 : i32
    return %c0_i32, %c0_i32_0 : i32, i32
  }
  func.func @transform_7(%arg0: i32) -> (i32, i32) {
    %c0_i32 = arith.constant 0 : i32
    %c0_i32_0 = arith.constant 0 : i32
    %c0_i32_1 = arith.constant 0 : i32
    return %c0_i32, %c0_i32_0 : i32, i32
  }
  func.func @transform_8(%arg0: i32) -> (i32, i32) {
    %c0_i32 = arith.constant 0 : i32
    %c0_i32_0 = arith.constant 0 : i32
    %c0_i32_1 = arith.constant 0 : i32
    return %c0_i32, %c0_i32_0 : i32, i32
  }
  func.func @transform_9(%arg0: i32) -> (i32, i32) {
    %c0_i32 = arith.constant 0 : i32
    %c0_i32_0 = arith.constant 0 : i32
    %c0_i32_1 = arith.constant 0 : i32
    return %c0_i32, %c0_i32_0 : i32, i32
  }
  func.func @transform_10(%arg0: i32) -> (i32, i32) {
    %c0_i32 = arith.constant 0 : i32
    %c0_i32_0 = arith.constant 0 : i32
    %c0_i32_1 = arith.constant 0 : i32
    return %c0_i32, %c0_i32_0 : i32, i32
  }
  func.func @transform_11(%arg0: i32) -> (i32, i32) {
    %c0_i32 = arith.constant 0 : i32
    %c0_i32_0 = arith.constant 0 : i32
    %c0_i32_1 = arith.constant 0 : i32
    return %c0_i32, %c0_i32_0 : i32, i32
  }
}

</mosaic_0001>

<bundles_post_ra>
// kernel: tpu_custom_call.1
= control target key start
LH: loop header
LB: loop body
LE: loop exit
PB: predicated region body
PF: predicated region fallthrough
CT: control target
= control target key end

     0   :  { %17 = vsyncpa [#allocation3], 0  ;;  %s1191_s0 = inlined_call_operand.hbm [shape: f32[8,32], index: 0, kind: input, shape index: {}]   ;;  %s1192_s1 = inlined_call_operand.hbm [shape: f32[16,32], index: 1, kind: input, shape index: {}]   ;;  %s1193_s2 = inlined_call_operand.vmem [shape: bf16[16,8], index: 2, kind: input, shape index: {}]   ;;  %s1194_s3 = inlined_call_operand.vmem [shape: bf16[16,8], index: 3, kind: input, shape index: {}]   ;;  %s1195_s4 = inlined_call_operand.vmem [shape: f32[8,1], index: 4, kind: input, shape index: {}]   ;;  %s1196_s5 = inlined_call_operand.vmem [shape: f32[16,1], index: 5, kind: input, shape index: {}]   ;;  %s1197_s6 = inlined_call_operand.vmem [shape: f32[32,128], index: 6, kind: input, shape index: {}]   ;;  %s1198_s7 = inlined_call_operand.hbm [shape: f32[1,128], index: 7, kind: input, shape index: {}]   ;;  %s1199_s8 = inlined_call_operand.vmem [shape: f32[32,32], index: 8, kind: input, shape index: {}]   ;;  %s1200_s9 = inlined_call_operand.hbm [shape: f32[5,32], index: 9, kind: input, shape index: {}]   ;;  %s1201_s10 = inlined_call_operand.hbm [shape: f32[8,32], index: 10, kind: output, shape index: {0}]   ;;  %s1202_s11 = inlined_call_operand.hbm [shape: f32[16,32], index: 11, kind: output, shape index: {1}]  }
   0x1   :  { %18 = vsyncpa [#allocation6], 0 }
   0x2   :  { %19 = vsyncpa [#allocation9], 0 }
   0x3   :  { %20 = vsyncpa [#allocation4], 0 }
   0x4   :  { %21 = vsyncpa [#allocation12], 0  ;;  %s991_s17 = smov [#allocation5]  }
   0x5   :  { %s37_s18 = sshll.u32 %s991_s17, 4  ;;  %s38_s18 = int_to_ptr.vmem [resolvable:$true] %s37_s18 }
   0x6   :  { %s869_s19 = scalar_lea.vmem %s38_s18, 256  ;;  %p874_p1 = scmp.lt.s32.totalorder %s38_s18, %s38_s18 }
   0x7   :  { %p870_p0 = scmp.ne.s32.totalorder %s38_s18, %s869_s19  ;;  %p875_p2 = scmp.lt.s32.totalorder %s869_s19, %s869_s19 }
   0x9   :  { %p876_p3 = por %p875_p2, %p874_p1 }
   0xb   :  { %p877_p4 = pnand %p876_p3, %p870_p0 }
   0xd   :  { %880 = shalt.err (!%p877_p4)
}
   0xe   :  { %s992_s20 = smov 128   ;;  %s993_s21 = smov 8  }
   0xf   :  { %43 = dma.hbm_to_vmem [thread:$0]  %s1192_s1, 256, %s38_s18, [#allocation6], %s992_s20, %s992_s20, %s993_s21  }
  0x10   :  { %s994_s24 = smov [#allocation2]   ;;  %s995_s26 = smov [#allocation7]  }
  0x11   :  { %s28_s25 = sshll.u32 %s994_s24, 4  ;;  %s60_s27 = sshll.u32 %s995_s26, 4  ;;  %s29_s25 = int_to_ptr.vmem [resolvable:$true] %s28_s25  ;;  %s61_s27 = int_to_ptr.vmem [resolvable:$true] %s60_s27 }
  0x12   :  { %s889_s28 = scalar_lea.vmem %s29_s25, 128  ;;  %p894_p6 = scmp.lt.s32.totalorder %s29_s25, %s29_s25 }
  0x13   :  { %p890_p5 = scmp.ne.s32.totalorder %s29_s25, %s889_s28  ;;  %p895_p7 = scmp.lt.s32.totalorder %s889_s28, %s889_s28 }
  0x15   :  { %p896_p8 = por %p895_p7, %p894_p6 }
  0x17   :  { %p897_p9 = pnand %p896_p8, %p890_p5 }
  0x19   :  { %900 = shalt.err (!%p897_p9)
}
  0x1a   :  { %31 = dma.hbm_to_vmem [thread:$0]  %s1191_s0, 128, %s29_s25, [#allocation3]  }
  0x1b   :  { %s909_s12 = scalar_lea.vmem %s61_s27, 16  ;;  %s913_s1 = scalar_lea.vmem %s61_s27, 32 }
  0x1c   :  { %p910_p10 = scmp.ne.s32.totalorder %s61_s27, %s909_s12  ;;  %p914_p11 = scmp.lt.s32.totalorder %s61_s27, %s61_s27 }
  0x1d   :  { %p915_p12 = scmp.lt.s32.totalorder %s913_s1, %s909_s12 }
  0x1f   :  { %p916_p13 = por %p915_p12, %p914_p11 }
  0x21   :  { %p917_p0 = pnand %p916_p13, %p910_p10 }
  0x23   :  { %920 = shalt.err (!%p917_p0)
}
  0x24   :  { %63 = dma.hbm_to_vmem [thread:$0]  %s1198_s7, 16, %s61_s27, [#allocation6]  }
  0x25   :  { %s996_s15 = smov [#allocation8]  }
  0x26   :  { %s72_s16 = sshll.u32 %s996_s15, 4  ;;  %s73_s16 = int_to_ptr.vmem [resolvable:$true] %s72_s16 }
  0x27   :  { %s929_s17 = scalar_lea.vmem %s73_s16, 128  ;;  %p934_p2 = scmp.lt.s32.totalorder %s73_s16, %s73_s16 }
  0x28   :  { %p930_p1 = scmp.ne.s32.totalorder %s73_s16, %s929_s17  ;;  %p935_p3 = scmp.lt.s32.totalorder %s929_s17, %s929_s17 }
  0x2a   :  { %p936_p4 = por %p935_p3, %p934_p2 }
  0x2c   :  { %p937_p5 = pnand %p936_p4, %p930_p1 }
  0x2e   :  { %940 = shalt.err (!%p937_p5)
}
  0x2f   :  { %75 = dma.hbm_to_vmem [thread:$0]  %s1200_s9, 128, %s73_s16, [#allocation9]  }
  0x30   :  { %981 = dma.done.wait [#allocation3], 128  }
  0x31   :  { %982 = vsyncadd [#allocation3], 4294967168 }
  0x32   :  { %983 = dma.done.wait [#allocation6], 272  }
  0x33   :  { %984 = vsyncadd [#allocation6], 4294967024 }
  0x34   :  { %985 = dma.done.wait [#allocation9], 128  }
  0x35   :  { %986 = vsyncadd [#allocation9], 4294967168  ;;  %v997_v0 = vmov 0.0   ;;  %vm998_vm0 = vmmov 0   ;;  %v99_v1 = vld [vmem:[%s1197_s6 + $0x18] sm:$0xff]  ;;  %v98_v2 = vld [vmem:[%s1197_s6 + $0x10] sm:$0xff] }
  0x36   :  { %793 = vmatprep.subr.mxu0 %v997_v0  ;;  %801 = vmatprep.mubr.msk.f32.mxu0 %vm998_vm0, %v997_v0  ;;  %v97_v3 = vld [vmem:[%s1197_s6 + $0x8] sm:$0xff]  ;;  %v96_v4 = vld [vmem:[%s1197_s6] sm:$0xff]  ;;  %vm107_vm1 = vcmask 261120   ;;  %vm278_vm2 = vcmask 64512   ;;  %v184_v8 = vld [vmem:[%s1199_s8 + $0x18] sm:$0xff]  ;;  %s1001_s17 = smov 32  }
  0x37   :  { %794 = vmatpush3.msra.mxu0 %v99_v1  ;;  %v1097_v5 = vld [vmem:[#allocation2] sm:$0xff]  ;;  %v183_v9 = vld [vmem:[%s1199_s8 + $0x10] sm:$0xff]  ;;  %804 = vmatprep.subr.mxu1 %v184_v8  ;;  %v1111_v10 = vld [vmem:[#allocation5] sm:$0xff]  ;;  %vm513_vm3 = vcmask 130048   ;;  %v1002_v53 = vmov 0   ;;  %vm621_vm5 = vcmask 1048320  }
  0x38   :  { %795 = vmatprep.subr.mxu0 %v997_v0  ;;  %v766_v6 = vld [vmem:[%s1193_s2] sm:$0xff]   ;;  %805 = vmatpush3.msra.mxu1 %v184_v8  ;;  %v182_v11 = vld [vmem:[%s1199_s8 + $0x8] sm:$0xff]  ;;  %v1122_v13 = vld [vmem:[#allocation5 + $0x8] sm:$0xff] }
  0x39   :  { %796 = vmatpush3.msra.mxu0 %v98_v2  ;;  %v767_v7 = vunpack.c.l.bf16 %v766_v6  ;;  %806 = vmatprep.subr.mxu1 %v183_v9  ;;  %v181_v12 = vld [vmem:[%s1199_s8] sm:$0xff]  ;;  %v749_v16 = vld [vmem:[#allocation7] ss:$0 sm:$0xff]  ;;  %v768_v19 = vunpack.c.h.bf16 %v766_v6  ;;  %s999_s8 = smov 64   ;;  %v751_v26 = vld [vmem:[#allocation8] ss:$0 sm:$0xff] }
  0x3a   :  { %797 = vmatprep.subr.mxu0 %v997_v0  ;;  %812 = vmatprep.mubr.msk.f32.mxu1 %vm107_vm1, %v1111_v10  ;;  %v770_v14 = vld [vmem:[%s1194_s3] sm:$0xff]   ;;  %s1000_s3 = smov 96   ;;  %v608_v62 = vld [vmem:[%s1196_s5 + $0x8] sm:$0xff]  ;;  %v761_v63 = vld [vmem:[#allocation8 + $0x1] ss:$0 sm:$0xff] }
  0x3b   :  { %798 = vmatpush3.msra.mxu0 %v97_v3  ;;  %807 = vmatpush3.msra.mxu1 %v183_v9  ;;  %v771_v15 = vunpack.c.l.bf16 %v770_v14  ;;  %v772_v21 = vunpack.c.h.bf16 %v770_v14  ;;  %v600_v56 = vld [vmem:[%s1195_s4] sm:$0xff]  ;;  %s1003_s4 = smov [#allocation11]  }
  0x3c   :  { %799 = vmatprep.subr.mxu0 %v997_v0  ;;  %808 = vmatprep.subr.mxu1 %v182_v11  ;;  %v607_v61 = vld [vmem:[%s1196_s5] sm:$0xff]  ;;  %s731_s5 = sshll.u32 %s1003_s4, 4  ;;  %s732_s5 = int_to_ptr.vmem [resolvable:$true] %s731_s5 }
  0x3d   :  { %800 = vmatpush3.msra.mxu0 %v96_v4  ;;  %809 = vmatpush3.msra.mxu1 %v182_v11  ;;  %s941_s9 = scalar_lea.vmem %s732_s5, 256  ;;  %p946_p7 = scmp.lt.s32.totalorder %s732_s5, %s732_s5 }
  0x3e   :  { %802 = vmatmul.mubr.msk.f32.vlgmr.msra.gmra.mxu0 %vm107_vm1, %v1097_v5  ;;  %810 = vmatprep.subr.mxu1 %v181_v12  ;;  %p942_p6 = scmp.ne.s32.totalorder %s732_s5, %s941_s9  ;;  %p947_p8 = scmp.lt.s32.totalorder %s941_s9, %s941_s9 }
  0x3f   :  { %817 = vmatprep.mubr.msk.f32.mxu0 %vm278_vm2, %v767_v7  ;;  %811 = vmatpush3.msra.mxu1 %v181_v12 }
  0x40   :  { %813 = vmatmul.mubr.msk.f32.vlgmr.msra.gmra.mxu1 %vm107_vm1, %v1122_v13  ;;  %846 = vset.pattern.permute.xlu0 %v1002_v53  ;;  %p948_p9 = por %p947_p8, %p946_p7 }
  0x41   :  { %822 = vmatprep.mubr.msk.f32.mxu1 %vm278_vm2, %v771_v15 }
  0x42   :  { %p949_p10 = pnand %p948_p9, %p942_p6 }
  0xfe   :  { %v177_v17 = vpop.f32.mrf.mxu0 }
  0xff   :  { %v1130_v18 = vadd.f32 %v749_v16, %v177_v17 }
 0x100   :  { %v803_v20 = vpop.f32.mrf.mxu0  ;;  %v814_v25 = vpop.f32.mrf.mxu1 }
 0x101   :  { %361 = vrot.lane.b32.xlu0 %v1130_v18, %s999_s8  ;;  %815 = vmatprep.subr.mxu0 %v1130_v18  ;;  %v267_v27 = vadd.f32 %v814_v25, %v751_v26 }
 0x102   :  { %816 = vmatpush3.msra.mxu0 %v1130_v18  ;;  %v261_v28 = vpop.f32.mrf.mxu1 }
 0x103   :  { %818 = vmatmul.mubr.msk.f32.vlgmr.msra.gmra.mxu0 %vm278_vm2, %v768_v19  ;;  %825 = vmatprep.subr.mxu0 %v997_v0  ;;  %v262_v29 = vadd.f32 %v751_v26, %v261_v28 }
 0x104   :  { %829 = vmatprep.mubr.msk.f32.mxu0 %vm998_vm0, %v997_v0 }
 0x173   :  { %v362_v22 = vpop.permute.xlu0 %361 }
 0x174   :  { %820 = vmatprep.subr.mxu1 %v362_v22 }
 0x175   :  { %821 = vmatpush3.msra.mxu1 %v362_v22 }
 0x176   :  { %823 = vmatmul.mubr.msk.f32.vlgmr.msra.gmra.mxu1 %vm278_vm2, %v772_v21 }
 0x1c3   :  { %v819_v23 = vpop.f32.mrf.mxu0 }
 0x1c4   :  { %465 = vrot.lane.b32.xlu0 %v819_v23, %s1000_s3  ;;  %v446_v30 = vadd.f32 %v819_v23, %v267_v27 }
 0x1c5   :  { %v351_v24 = vpop.f32.mrf.mxu0 }
 0x1c6   :  { %463 = vrot.lane.b32.xlu1 %v351_v24, %s1000_s3  ;;  %v445_v33 = vadd.f32 %v351_v24, %v262_v29 }
 0x236   :  { %v824_v31 = vpop.f32.mrf.mxu1  ;;  %v466_v44 = vpop.permute.xlu0 %465 }
 0x237   :  { %v1142_v32 = vadd.f32 %v824_v31, %v446_v30 }
 0x238   :  { %v436_v34 = vpop.f32.mrf.mxu1  ;;  %v464_v45 = vpop.permute.xlu1 %463 }
 0x239   :  { %v759_v35 = vmul.f32 -1.442695, %v1142_v32  ;;  %v1145_v36 = vadd.f32 %v445_v33, %v436_v34 }
 0x23b   :  { %847 = vpow2.f32 %v759_v35  ;;  %v758_v37 = vmul.f32 -1.442695, %v1145_v36 }
 0x23d   :  { %849 = vpow2.f32 %v758_v37 }
 0x248   :  { %v848_v38 = vpop.eup %847 }
 0x249   :  { %v456_v39 = vadd.f32 1.0, %v848_v38 }
 0x24a   :  { %v850_v40 = vpop.eup %849 }
 0x24b   :  { %851 = vrcp.f32 %v456_v39  ;;  %v455_v41 = vadd.f32 1.0, %v850_v40 }
 0x24d   :  { %853 = vrcp.f32 %v455_v41 }
 0x258   :  { %v852_v42 = vpop.eup %851 }
 0x259   :  { %475 = vrot.lane.b32.xlu1 %v852_v42, %s1001_s17  ;;  %v470_v46 = vmul.f32 %v852_v42, %v466_v44 }
 0x25a   :  { %v854_v43 = vpop.eup %853 }
 0x25b   :  { %473 = vrot.lane.b32.xlu0 %v854_v43, %s1001_s17  ;;  %v469_v48 = vmul.f32 %v854_v43, %v464_v45 }
 0x282   :  { %481 = vxpose.xlu1.b32.start [1/2] (short) (narrow) %v771_v15, 8 }
 0x286   :  { %482 = vxpose.xlu1.b32.end [2/2] (short) (narrow) %v772_v21, 8 }
 0x2cb   :  { %v476_v47 = vpop.permute.xlu1 %475 }
 0x2cc   :  { %v480_v49 = vsel %vm107_vm1, %v470_v46, %v476_v47 }
 0x2cd   :  { %826 = vmatpush3.msra.mxu0 %v480_v49  ;;  %v474_v50 = vpop.permute.xlu0 %473 }
 0x2ce   :  { %v479_v51 = vsel %vm107_vm1, %v469_v48, %v474_v50  ;;  %827 = vmatprep.subr.mxu0 %v997_v0  ;;  %v762_v0 = vld [vmem:[#allocation8 + $0x2] ss:$0 sm:$0xff] }
 0x2cf   :  { %828 = vmatpush3.msra.mxu0 %v479_v51 }
 0x2fe   :  { %v497_v52 = vpop.trf.xlu1 }
 0x2ff   :  { %830 = vmatmul.mubr.msk.f32.vlgmr.msra.gmra.mxu0 %vm513_vm3, %v497_v52 }
 0x3bf   :  { %v583_v54 = vpop.f32.mrf.mxu0 }
 0x3c0   :  { %588 = vrot.lane.b32.xlu0 %v583_v54, %s1000_s3 }
 0x3c1   :  { %v831_v55 = vpop.f32.mrf.mxu0 }
 0x3c4   :  { %603 = vperm.xlu0 %846, %v600_v56  }
 0x432   :  { %v589_v57 = vpop.permute.xlu0 %588 }
 0x433   :  { %855 = vrcp.f32 %v589_v57 }
 0x43f   :  { %v604_v1 = vpop.permute.xlu0 %603 }
 0x440   :  { %v856_v58 = vpop.eup %855 }
 0x441   :  { %v592_v59 = vmul.f32 %v856_v58, %v583_v54 }
 0x443   :  { %vm593_vm4 = vcmp.ne.f32.partialorder %v592_v59, %v592_v59 }
 0x444   :  { %v594_v60 = vsel %vm593_vm4, 0.0, %v592_v59 }
 0x445   :  { %596 = vrot.lane.b32.xlu0 %v594_v60, %s1000_s3 }
 0x449   :  { %611 = vperm.xlu0 %846, %v607_v61  }
 0x44d   :  { %616 = vperm.xlu0 %846, %v608_v62  }
 0x451   :  { %649 = vrot.lane.b32.xlu0 %v761_v63, %s1000_s3 }
 0x455   :  { %658 = vrot.lane.b32.xlu0 %v762_v0, %s1000_s3  ;;  %v763_v0 = vld [vmem:[#allocation8 + $0x3] ss:$0 sm:$0xff] }
 0x4b7   :  { %v597_v2 = vpop.permute.xlu0 %596 }
 0x4b8   :  { %v599_v3 = vadd.f32 %v597_v2, %v1130_v18 }
 0x4ba   :  { %v606_v4 = vmul.f32 %v604_v1, %v599_v3  ;;  %v764_v3 = vld [vmem:[#allocation8 + $0x4] ss:$0 sm:$0xff] }
 0x4bc   :  { %v622_v6 = vsel %vm621_vm5, %v606_v4, 0.0 }
 0x4bd   :  { %v623_v7 = vrot.slane %v622_v6, 4 }
 0x4bf   :  { %v624_v8 = vadd.f32 %v623_v7, %v622_v6 }
 0x4c1   :  { %v625_v9 = vrot.slane %v624_v8, 2 }
 0x4c3   :  { %v626_v11 = vadd.f32 %v625_v9, %v624_v8 }
 0x4c4   :  { %v612_v12 = vpop.permute.xlu0 %611 }
 0x4c5   :  { %v627_v14 = vrot.slane %v626_v11, 1  ;;  %v619_v15 = vmul.f32 %v612_v12, %v1145_v36 }
 0x4c7   :  { %v628_v16 = vadd.f32 %v627_v14, %v626_v11  ;;  %v662_v21 = vsel %vm107_vm1, %v619_v15, 0.0 }
 0x4c8   :  { %v617_v17 = vpop.permute.xlu0 %616 }
 0x4c9   :  { %v620_v19 = vmul.f32 %v617_v17, %v1142_v32  ;;  %v630_v20 = vmul.f32 0.125, %v628_v16 }
 0x4cb   :  { %v663_v18 = vsel %vm107_vm1, %v620_v19, 0.0  ;;  %v631_v22 = vsub.f32 %v606_v4, %v630_v20 }
 0x4cc   :  { %v664_v23 = vadd.f32 %v663_v18, %v662_v21  ;;  %v650_v52 = vpop.permute.xlu0 %649 }
 0x4cd   :  { %v632_v24 = vmul.f32 %v631_v22, %v631_v22 }
 0x4ce   :  { %v665_v25 = vrot.slane %v664_v23, 4 }
 0x4cf   :  { %v633_v26 = vsel %vm621_vm5, %v632_v24, 0.0 }
 0x4d0   :  { %v666_v27 = vadd.f32 %v665_v25, %v664_v23  ;;  %v634_v28 = vrot.slane %v633_v26, 4  ;;  %v659_v58 = vpop.permute.xlu0 %658 }
 0x4d2   :  { %v667_v29 = vrot.slane %v666_v27, 2  ;;  %v635_v30 = vadd.f32 %v634_v28, %v633_v26 }
 0x4d4   :  { %v668_v31 = vadd.f32 %v667_v29, %v666_v27  ;;  %v636_v33 = vrot.slane %v635_v30, 2 }
 0x4d6   :  { %v669_v34 = vrot.slane %v668_v31, 1  ;;  %v637_v35 = vadd.f32 %v636_v33, %v635_v30 }
 0x4d8   :  { %v670_v32 = vadd.f32 %v669_v34, %v668_v31  ;;  %v638_v36 = vrot.slane %v637_v35, 1 }
 0x4da   :  { %v672_v37 = vmul.f32 0.0625, %v670_v32  ;;  %v639_v38 = vadd.f32 %v638_v36, %v637_v35 }
 0x4dc   :  { %v673_v39 = vsub.f32 %v619_v15, %v672_v37  ;;  %v674_v40 = vsub.f32 %v620_v19, %v672_v37  ;;  %v640_v41 = vmul.f32 0.125, %v639_v38 }
 0x4de   :  { %v675_v42 = vmul.f32 %v673_v39, %v673_v39  ;;  %v676_v43 = vmul.f32 %v674_v40, %v674_v40  ;;  %v641_v44 = vadd.f32 1e-05, %v640_v41 }
 0x4e0   :  { %v677_v45 = vsel %vm107_vm1, %v675_v42, 0.0  ;;  %v678_v46 = vsel %vm107_vm1, %v676_v43, 0.0  ;;  %857 = vrsqrt.f32 %v641_v44 }
 0x4e1   :  { %v679_v47 = vadd.f32 %v678_v46, %v677_v45 }
 0x4e3   :  { %v680_v48 = vrot.slane %v679_v47, 4 }
 0x4e5   :  { %v681_v49 = vadd.f32 %v680_v48, %v679_v47 }
 0x4e7   :  { %v682_v50 = vrot.slane %v681_v49, 2 }
 0x4e9   :  { %v683_v51 = vadd.f32 %v682_v50, %v681_v49 }
 0x4eb   :  { %v684_v53 = vrot.slane %v683_v51, 1 }
 0x4ed   :  { %v858_v54 = vpop.eup %857  ;;  %v685_v55 = vadd.f32 %v684_v53, %v683_v51 }
 0x4ee   :  { %v643_v56 = vmul.f32 %v858_v54, %v631_v22 }
 0x4ef   :  { %v686_v57 = vmul.f32 0.0625, %v685_v55 }
 0x4f0   :  { %v652_v59 = vmul.f32 %v650_v52, %v643_v56 }
 0x4f1   :  { %v687_v60 = vadd.f32 1e-05, %v686_v57 }
 0x4f2   :  { %v661_v61 = vadd.f32 %v659_v58, %v652_v59 }
 0x4f3   :  { %859 = vrsqrt.f32 %v687_v60 }
 0x4f4   :  { %v703_v62 = vmax.f32 %v661_v61, 0.0 }
 0x4f6   :  { %705 = vrot.lane.b32.xlu0 %v703_v62, %s1001_s17 }
 0x500   :  { %v860_v63 = vpop.eup %859 }
 0x501   :  { %v689_v1 = vmul.f32 %v860_v63, %v673_v39  ;;  %v690_v2 = vmul.f32 %v860_v63, %v674_v40 }
 0x503   :  { %v695_v4 = vmul.f32 %v763_v0, %v689_v1  ;;  %v696_v6 = vmul.f32 %v763_v0, %v690_v2 }
 0x505   :  { %v702_v7 = vadd.f32 %v764_v3, %v696_v6  ;;  %v701_v8 = vadd.f32 %v764_v3, %v695_v4 }
 0x507   :  { %v711_v9 = vmax.f32 %v702_v7, 0.0  ;;  %v710_v11 = vmax.f32 %v701_v8, 0.0 }
 0x509   :  { %v712_v12 = vadd.f32 %v710_v11, %v1111_v10  ;;  %v713_v14 = vadd.f32 %v711_v9, %v1122_v13 }
 0x50b   :  { %714 = vst.msk [vmem:[#allocation11] sm:$0xff] %vm107_vm1, %v712_v12  ;;  %715 = vst.msk [vmem:[#allocation11 + $0x8] sm:$0xff] %vm107_vm1, %v713_v14 }
 0x50c   :  { %952 = shalt.err (!%p949_p10)
}
 0x50d   :  { %737 = dma.vmem_to_hbm [thread:$0]  %s732_s5, 256, %s1202_s11, [#allocation12], %s992_s20, %s992_s20, %s993_s21  }
 0x50e   :  { %s1004_s26 = smov [#allocation10]  }
 0x50f   :  { %s722_s27 = sshll.u32 %s1004_s26, 4  ;;  %s723_s27 = int_to_ptr.vmem [resolvable:$true] %s722_s27 }
 0x510   :  { %s961_s28 = scalar_lea.vmem %s723_s27, 128  ;;  %p966_p12 = scmp.lt.s32.totalorder %s723_s27, %s723_s27 }
 0x511   :  { %p962_p11 = scmp.ne.s32.totalorder %s723_s27, %s961_s28  ;;  %p967_p13 = scmp.lt.s32.totalorder %s961_s28, %s961_s28 }
 0x513   :  { %p968_p0 = por %p967_p13, %p966_p12 }
 0x515   :  { %p969_p1 = pnand %p968_p0, %p962_p11 }
 0x568   :  { %v706_v10 = vpop.permute.xlu0 %705 }
 0x569   :  { %v708_v13 = vadd.f32 %v706_v10, %v1097_v5 }
 0x56b   :  { %709 = vst.msk [vmem:[#allocation10] sm:$0xff] %vm107_vm1, %v708_v13 }
 0x56c   :  { %972 = shalt.err (!%p969_p1)
}
 0x56d   :  { %725 = dma.vmem_to_hbm [thread:$0]  %s723_s27, 128, %s1201_s10, [#allocation4]  }
 0x56e   :  { %987 = dma.done.wait [#allocation4], 128  }
 0x56f   :  { %988 = vsyncadd [#allocation4], 4294967168 }
 0x570   :  { %989 = dma.done.wait [#allocation12], 256  }
 0x571   :  { %990 = vsyncadd [#allocation12], 4294967040 }
 0x572   :  { %744 = vsyncpa [#allocation3], 1 }
 0x573   :  { %745 = vsyncpa [#allocation6], 1 }
 0x574   :  { %746 = vsyncpa [#allocation9], 1 }
 0x575   :  { %747 = vsyncpa [#allocation4], 1 }
 0x576   :  { %748 = vsyncpa [#allocation12], 1 }

</bundles_post_ra>
